<compile_context>
chip_gen: v7x
topology: tpu7x:2x2x1
jax: 0.10.0
libtpu: 0.0.40
codegen_flags: <defaults>
</compile_context>

<pallas_src>
import math

import jax
import jax.numpy as jnp
from jax.experimental import pallas as pl
from jax.experimental.pallas import tpu as pltpu


# ---------------------------------------------------------------------------
# Kernels
# ---------------------------------------------------------------------------
def _var_gru_train_kernel(x_ref, h_ref, nin_ref, nh_ref,
                          wih_ref, whh_ref, bih_ref, bhh_ref, out_ref):
    """Training-mode kernel: per-gate variational noise applied to x and h."""
    x = x_ref[...]          # (TB, Dp) f32
    h = h_ref[...]          # (TB, Hp) f32

    def gate(g):
        # Apply per-gate noise in f32, feed the MXU in bf16, accumulate in f32.
        xg = (x * nin_ref[g]).astype(jnp.bfloat16)
        hg = (h * nh_ref[g]).astype(jnp.bfloat16)
        gi = jnp.dot(xg, wih_ref[g], preferred_element_type=jnp.float32) + bih_ref[g]
        gh = jnp.dot(hg, whh_ref[g], preferred_element_type=jnp.float32) + bhh_ref[g]
        return gi, gh

    gi_r, gh_r = gate(0)
    gi_z, gh_z = gate(1)
    gi_n, gh_n = gate(2)

    resetgate = jax.nn.sigmoid(gi_r + gh_r)
    inputgate = jax.nn.sigmoid(gi_z + gh_z)
    newgate = jnp.tanh(gi_n + resetgate * gh_n)

    out_ref[...] = newgate + inputgate * (h - newgate)


def _var_gru_eval_kernel(x_ref, h_ref,
                         wih_ref, whh_ref, bih_ref, bhh_ref, out_ref):
    """Eval-mode kernel: no noise operands at all (halves activation DMA)."""
    h = h_ref[...]                      # (TB, Hp) f32
    xb = x_ref[...].astype(jnp.bfloat16)
    hb = h.astype(jnp.bfloat16)

    def gate(g):
        gi = jnp.dot(xb, wih_ref[g], preferred_element_type=jnp.float32) + bih_ref[g]
        gh = jnp.dot(hb, whh_ref[g], preferred_element_type=jnp.float32) + bhh_ref[g]
        return gi, gh

    gi_r, gh_r = gate(0)
    gi_z, gh_z = gate(1)
    gi_n, gh_n = gate(2)

    resetgate = jax.nn.sigmoid(gi_r + gh_r)
    inputgate = jax.nn.sigmoid(gi_z + gh_z)
    newgate = jnp.tanh(gi_n + resetgate * gh_n)

    out_ref[...] = newgate + inputgate * (h - newgate)


# ---------------------------------------------------------------------------
# Wrapper
# ---------------------------------------------------------------------------
def _round_up(n, m):
    return ((n + m - 1) // m) * m


def _pad_to(a, shape):
    pads = [(0, s - d) for d, s in zip(a.shape, shape)]
    return jnp.pad(a, pads)


def var_gru_cell(x, hx, weight_ih, weight_hh, bias_ih=None, bias_hh=None,
                 noise_in=None, noise_hidden=None, *, block_b=256):
    """JAX/Pallas mirror of VarGRUCell.forward.

    x:  (B, D)                    hx: (B, H)
    weight_ih: (3, D, H)          weight_hh: (3, H, H)
    bias_ih / bias_hh: (3, H) or None
    noise_in:  (3, B, D) or None  noise_hidden: (3, B, H) or None
    """
    B, D = x.shape
    H = hx.shape[1]
    f32 = jnp.float32

    if bias_ih is None:
        bias_ih = jnp.zeros((3, H), f32)
    if bias_hh is None:
        bias_hh = jnp.zeros((3, H), f32)

    # Lane-dense padding: last (lane) dims to multiples of 128, batch tile to
    # a multiple of 8 sublanes.
    Dp = _round_up(D, 128)
    Hp = _round_up(H, 128)
    tb = min(block_b, _round_up(B, 8))
    tb = _round_up(tb, 8)
    Bp = _round_up(B, tb)

    xp = _pad_to(x.astype(f32), (Bp, Dp))
    hp = _pad_to(hx.astype(f32), (Bp, Hp))
    # Resident weights in bf16 (MXU operands), biases in f32.
    wih = _pad_to(weight_ih.astype(f32), (3, Dp, Hp)).astype(jnp.bfloat16)
    whh = _pad_to(weight_hh.astype(f32), (3, Hp, Hp)).astype(jnp.bfloat16)
    bih = _pad_to(bias_ih.astype(f32), (3, Hp)).reshape(3, 1, Hp)
    bhh = _pad_to(bias_hh.astype(f32), (3, Hp)).reshape(3, 1, Hp)

    grid = (Bp // tb,)

    # Batch-tiled activations / output; grid-invariant (resident) weights.
    spec_x = pl.BlockSpec((tb, Dp), lambda i: (i, 0))
    spec_h = pl.BlockSpec((tb, Hp), lambda i: (i, 0))
    spec_wih = pl.BlockSpec((3, Dp, Hp), lambda i: (0, 0, 0))
    spec_whh = pl.BlockSpec((3, Hp, Hp), lambda i: (0, 0, 0))
    spec_bias = pl.BlockSpec((3, 1, Hp), lambda i: (0, 0, 0))
    spec_out = pl.BlockSpec((tb, Hp), lambda i: (i, 0))

    cparams = pltpu.CompilerParams(
        dimension_semantics=("parallel",),
        vmem_limit_bytes=64 * 1024 * 1024,
    )

    if noise_in is None and noise_hidden is None:
        out = pl.pallas_call(
            _var_gru_eval_kernel,
            out_shape=jax.ShapeDtypeStruct((Bp, Hp), f32),
            grid=grid,
            in_specs=[spec_x, spec_h, spec_wih, spec_whh, spec_bias, spec_bias],
            out_specs=spec_out,
            compiler_params=cparams,
        )(xp, hp, wih, whh, bih, bhh)
    else:
        if noise_in is None:
            noise_in = jnp.ones((3, B, D), f32)
        if noise_hidden is None:
            noise_hidden = jnp.ones((3, B, H), f32)
        nin = _pad_to(noise_in.astype(f32), (3, Bp, Dp))
        nh = _pad_to(noise_hidden.astype(f32), (3, Bp, Hp))
        spec_nin = pl.BlockSpec((3, tb, Dp), lambda i: (0, i, 0))
        spec_nh = pl.BlockSpec((3, tb, Hp), lambda i: (0, i, 0))
        out = pl.pallas_call(
            _var_gru_train_kernel,
            out_shape=jax.ShapeDtypeStruct((Bp, Hp), f32),
            grid=grid,
            in_specs=[spec_x, spec_h, spec_nin, spec_nh,
                      spec_wih, spec_whh, spec_bias, spec_bias],
            out_specs=spec_out,
            compiler_params=cparams,
        )(xp, hp, nin, nh, wih, whh, bih, bhh)

    return out[:B, :H]


# ---------------------------------------------------------------------------
# Pure-JAX reference (mirrors the PyTorch rnn_F.VarGRUCell path)
# ---------------------------------------------------------------------------
def _reference(x, hx, w_ih, w_hh, b_ih, b_hh, noise_in=None, noise_hidden=None):
    if noise_in is None:
        xi = jnp.broadcast_to(x[None], (3,) + x.shape)
    else:
        xi = x[None] * noise_in
    if noise_hidden is None:
        hi = jnp.broadcast_to(hx[None], (3,) + hx.shape)
    else:
        hi = hx[None] * noise_hidden
    gi = jnp.einsum("gbd,gdh->gbh", xi, w_ih) + b_ih[:, None, :]
    gh = jnp.einsum("gbh,ghk->gbk", hi, w_hh) + b_hh[:, None, :]
    r = jax.nn.sigmoid(gi[0] + gh[0])
    z = jax.nn.sigmoid(gi[1] + gh[1])
    n = jnp.tanh(gi[2] + r * gh[2])
    return n + z * (hx - n)


# ---------------------------------------------------------------------------
# Self-test
# ---------------------------------------------------------------------------
if __name__ == "__main__":
    key = jax.random.PRNGKey(0)
    batch, input_size, hidden_size = 12, 24, 32
    p_in, p_hidden = 0.5, 0.5

    k_x, k_h, k_wih, k_whh, k_bih, k_bhh, k_nin, k_nh = jax.random.split(key, 8)

    stdv = 1.0 / math.sqrt(hidden_size)
    weight_ih = jax.random.uniform(k_wih, (3, input_size, hidden_size),
                                   jnp.float32, -stdv, stdv)
    weight_hh = jax.random.uniform(k_whh, (3, hidden_size, hidden_size),
                                   jnp.float32, -stdv, stdv)
    bias_ih = jax.random.uniform(k_bih, (3, hidden_size), jnp.float32, -stdv, stdv)
    bias_hh = jax.random.uniform(k_bhh, (3, hidden_size), jnp.float32, -stdv, stdv)

    x = jax.random.normal(k_x, (batch, input_size), jnp.float32)
    hx = jax.random.normal(k_h, (batch, hidden_size), jnp.float32)

    # reset_noise(batch) in training mode: per-gate bernoulli(1-p) / (1-p)
    noise_in = (jax.random.bernoulli(k_nin, 1.0 - p_in, (3, batch, input_size))
                .astype(jnp.float32) / (1.0 - p_in))
    noise_hidden = (jax.random.bernoulli(k_nh, 1.0 - p_hidden,
                                         (3, batch, hidden_size))
                    .astype(jnp.float32) / (1.0 - p_hidden))

    # training-mode call (use a small batch tile so the grid has >1 step)
    hy = var_gru_cell(x, hx, weight_ih, weight_hh, bias_ih, bias_hh,
                      noise_in, noise_hidden, block_b=8)
    jax.block_until_ready(hy)
    ref = _reference(x, hx, weight_ih, weight_hh, bias_ih, bias_hh,
                     noise_in, noise_hidden)
    assert hy.shape == (batch, hidden_size)
    # bf16 MXU operands with f32 accumulation -> loosened tolerance.
    assert jnp.allclose(hy, ref, atol=2e-2, rtol=2e-2), \
        f"train-mode mismatch: max abs err {jnp.max(jnp.abs(hy - ref))}"

    # eval-mode call (noise=None -> specialized kernel with no noise streams)
    hy_eval = var_gru_cell(x, hx, weight_ih, weight_hh, bias_ih, bias_hh)
    jax.block_until_ready(hy_eval)
    ref_eval = _reference(x, hx, weight_ih, weight_hh, bias_ih, bias_hh)
    assert jnp.allclose(hy_eval, ref_eval, atol=2e-2, rtol=2e-2), \
        f"eval-mode mismatch: max abs err {jnp.max(jnp.abs(hy_eval - ref_eval))}"

    print("KERNEL_OK")
</pallas_src>

<mosaic_0001>
module attributes {stable_mosaic.version = 11 : i64} {
  func.func @_var_gru_train_kernel(%arg0: i32, %arg1: memref<8x128xf32, #tpu.memory_space<vmem>>, %arg2: memref<8x128xf32, #tpu.memory_space<vmem>>, %arg3: memref<3x8x128xf32, #tpu.memory_space<vmem>>, %arg4: memref<3x8x128xf32, #tpu.memory_space<vmem>>, %arg5: memref<3x128x128xbf16, #tpu.memory_space<vmem>>, %arg6: memref<3x128x128xbf16, #tpu.memory_space<vmem>>, %arg7: memref<3x1x128xf32, #tpu.memory_space<vmem>>, %arg8: memref<3x1x128xf32, #tpu.memory_space<vmem>>, %arg9: memref<8x128xf32, #tpu.memory_space<vmem>>) attributes {dimension_semantics = [#tpu.dimension_semantics<parallel>], iteration_bounds = array<i64: 2>, scalar_prefetch = 0 : i64, scratch_operands = 0 : i64, tpu.core_type = #tpu.core_type<tc>, window_params = [{transform_indices = @transform_0, window_bounds = array<i64: 8, 128>}, {transform_indices = @transform_1, window_bounds = array<i64: 8, 128>}, {transform_indices = @transform_2, window_bounds = array<i64: 3, 8, 128>}, {transform_indices = @transform_3, window_bounds = array<i64: 3, 8, 128>}, {pipeline_mode = #tpu.pipeline_mode<synchronous>, transform_indices = @transform_4, window_bounds = array<i64: 3, 128, 128>}, {pipeline_mode = #tpu.pipeline_mode<synchronous>, transform_indices = @transform_5, window_bounds = array<i64: 3, 128, 128>}, {pipeline_mode = #tpu.pipeline_mode<synchronous>, transform_indices = @transform_6, window_bounds = array<i64: 3, 1, 128>}, {pipeline_mode = #tpu.pipeline_mode<synchronous>, transform_indices = @transform_7, window_bounds = array<i64: 3, 1, 128>}, {transform_indices = @transform_8, window_bounds = array<i64: 8, 128>}]} {
    %c0 = arith.constant 0 : index
    %c0_0 = arith.constant 0 : index
    %0 = vector.load %arg1[%c0, %c0_0] : memref<8x128xf32, #tpu.memory_space<vmem>>, vector<8x128xf32>
    %c0_1 = arith.constant 0 : index
    %c0_2 = arith.constant 0 : index
    %1 = vector.load %arg2[%c0_1, %c0_2] : memref<8x128xf32, #tpu.memory_space<vmem>>, vector<8x128xf32>
    %c0_3 = arith.constant 0 : index
    %c0_4 = arith.constant 0 : index
    %c0_5 = arith.constant 0 : index
    %2 = vector.load %arg3[%c0_3, %c0_4, %c0_5] : memref<3x8x128xf32, #tpu.memory_space<vmem>>, vector<1x8x128xf32>
    %3 = vector.shape_cast %2 : vector<1x8x128xf32> to vector<8x128xf32>
    %4 = arith.mulf %0, %3 : vector<8x128xf32>
    %5 = arith.truncf %4 : vector<8x128xf32> to vector<8x128xbf16>
    %c0_6 = arith.constant 0 : index
    %c0_7 = arith.constant 0 : index
    %c0_8 = arith.constant 0 : index
    %6 = vector.load %arg4[%c0_6, %c0_7, %c0_8] : memref<3x8x128xf32, #tpu.memory_space<vmem>>, vector<1x8x128xf32>
    %7 = vector.shape_cast %6 : vector<1x8x128xf32> to vector<8x128xf32>
    %8 = arith.mulf %1, %7 : vector<8x128xf32>
    %9 = arith.truncf %8 : vector<8x128xf32> to vector<8x128xbf16>
    %c0_9 = arith.constant 0 : index
    %c0_10 = arith.constant 0 : index
    %c0_11 = arith.constant 0 : index
    %10 = vector.load %arg5[%c0_9, %c0_10, %c0_11] : memref<3x128x128xbf16, #tpu.memory_space<vmem>>, vector<1x128x128xbf16>
    %11 = vector.shape_cast %10 : vector<1x128x128xbf16> to vector<128x128xbf16>
    %cst = arith.constant dense<0.000000e+00> : vector<8x128xf32>
    %12 = tpu.matmul %5, %11, %cst {dimension_numbers = #tpu.dot_dimension_numbers<[1], [0], [0], [1], [0, 0, 1, 1], [], []>} : vector<8x128xbf16>, vector<128x128xbf16>, vector<8x128xf32> -> vector<8x128xf32>
    %c0_12 = arith.constant 0 : index
    %c0_13 = arith.constant 0 : index
    %c0_14 = arith.constant 0 : index
    %13 = vector.load %arg7[%c0_12, %c0_13, %c0_14] : memref<3x1x128xf32, #tpu.memory_space<vmem>>, vector<1x1x128xf32>
    %14 = vector.shape_cast %13 : vector<1x1x128xf32> to vector<1x128xf32>
    %15 = vector.broadcast %14 : vector<1x128xf32> to vector<8x128xf32>
    %16 = arith.addf %12, %15 : vector<8x128xf32>
    %c0_15 = arith.constant 0 : index
    %c0_16 = arith.constant 0 : index
    %c0_17 = arith.constant 0 : index
    %17 = vector.load %arg6[%c0_15, %c0_16, %c0_17] : memref<3x128x128xbf16, #tpu.memory_space<vmem>>, vector<1x128x128xbf16>
    %18 = vector.shape_cast %17 : vector<1x128x128xbf16> to vector<128x128xbf16>
    %cst_18 = arith.constant dense<0.000000e+00> : vector<8x128xf32>
    %19 = tpu.matmul %9, %18, %cst_18 {dimension_numbers = #tpu.dot_dimension_numbers<[1], [0], [0], [1], [0, 0, 1, 1], [], []>} : vector<8x128xbf16>, vector<128x128xbf16>, vector<8x128xf32> -> vector<8x128xf32>
    %c0_19 = arith.constant 0 : index
    %c0_20 = arith.constant 0 : index
    %c0_21 = arith.constant 0 : index
    %20 = vector.load %arg8[%c0_19, %c0_20, %c0_21] : memref<3x1x128xf32, #tpu.memory_space<vmem>>, vector<1x1x128xf32>
    %21 = vector.shape_cast %20 : vector<1x1x128xf32> to vector<1x128xf32>
    %22 = vector.broadcast %21 : vector<1x128xf32> to vector<8x128xf32>
    %23 = arith.addf %19, %22 : vector<8x128xf32>
    %c1 = arith.constant 1 : index
    %c0_22 = arith.constant 0 : index
    %c0_23 = arith.constant 0 : index
    %24 = vector.load %arg3[%c1, %c0_22, %c0_23] : memref<3x8x128xf32, #tpu.memory_space<vmem>>, vector<1x8x128xf32>
    %25 = vector.shape_cast %24 : vector<1x8x128xf32> to vector<8x128xf32>
    %26 = arith.mulf %0, %25 : vector<8x128xf32>
    %27 = arith.truncf %26 : vector<8x128xf32> to vector<8x128xbf16>
    %c1_24 = arith.constant 1 : index
    %c0_25 = arith.constant 0 : index
    %c0_26 = arith.constant 0 : index
    %28 = vector.load %arg4[%c1_24, %c0_25, %c0_26] : memref<3x8x128xf32, #tpu.memory_space<vmem>>, vector<1x8x128xf32>
    %29 = vector.shape_cast %28 : vector<1x8x128xf32> to vector<8x128xf32>
    %30 = arith.mulf %1, %29 : vector<8x128xf32>
    %31 = arith.truncf %30 : vector<8x128xf32> to vector<8x128xbf16>
    %c1_27 = arith.constant 1 : index
    %c0_28 = arith.constant 0 : index
    %c0_29 = arith.constant 0 : index
    %32 = vector.load %arg5[%c1_27, %c0_28, %c0_29] : memref<3x128x128xbf16, #tpu.memory_space<vmem>>, vector<1x128x128xbf16>
    %33 = vector.shape_cast %32 : vector<1x128x128xbf16> to vector<128x128xbf16>
    %cst_30 = arith.constant dense<0.000000e+00> : vector<8x128xf32>
    %34 = tpu.matmul %27, %33, %cst_30 {dimension_numbers = #tpu.dot_dimension_numbers<[1], [0], [0], [1], [0, 0, 1, 1], [], []>} : vector<8x128xbf16>, vector<128x128xbf16>, vector<8x128xf32> -> vector<8x128xf32>
    %c1_31 = arith.constant 1 : index
    %c0_32 = arith.constant 0 : index
    %c0_33 = arith.constant 0 : index
    %35 = vector.load %arg7[%c1_31, %c0_32, %c0_33] : memref<3x1x128xf32, #tpu.memory_space<vmem>>, vector<1x1x128xf32>
    %36 = vector.shape_cast %35 : vector<1x1x128xf32> to vector<1x128xf32>
    %37 = vector.broadcast %36 : vector<1x128xf32> to vector<8x128xf32>
    %38 = arith.addf %34, %37 : vector<8x128xf32>
    %c1_34 = arith.constant 1 : index
    %c0_35 = arith.constant 0 : index
    %c0_36 = arith.constant 0 : index
    %39 = vector.load %arg6[%c1_34, %c0_35, %c0_36] : memref<3x128x128xbf16, #tpu.memory_space<vmem>>, vector<1x128x128xbf16>
    %40 = vector.shape_cast %39 : vector<1x128x128xbf16> to vector<128x128xbf16>
    %cst_37 = arith.constant dense<0.000000e+00> : vector<8x128xf32>
    %41 = tpu.matmul %31, %40, %cst_37 {dimension_numbers = #tpu.dot_dimension_numbers<[1], [0], [0], [1], [0, 0, 1, 1], [], []>} : vector<8x128xbf16>, vector<128x128xbf16>, vector<8x128xf32> -> vector<8x128xf32>
    %c1_38 = arith.constant 1 : index
    %c0_39 = arith.constant 0 : index
    %c0_40 = arith.constant 0 : index
    %42 = vector.load %arg8[%c1_38, %c0_39, %c0_40] : memref<3x1x128xf32, #tpu.memory_space<vmem>>, vector<1x1x128xf32>
    %43 = vector.shape_cast %42 : vector<1x1x128xf32> to vector<1x128xf32>
    %44 = vector.broadcast %43 : vector<1x128xf32> to vector<8x128xf32>
    %45 = arith.addf %41, %44 : vector<8x128xf32>
    %c2 = arith.constant 2 : index
    %c0_41 = arith.constant 0 : index
    %c0_42 = arith.constant 0 : index
    %46 = vector.load %arg3[%c2, %c0_41, %c0_42] : memref<3x8x128xf32, #tpu.memory_space<vmem>>, vector<1x8x128xf32>
    %47 = vector.shape_cast %46 : vector<1x8x128xf32> to vector<8x128xf32>
    %48 = arith.mulf %0, %47 : vector<8x128xf32>
    %49 = arith.truncf %48 : vector<8x128xf32> to vector<8x128xbf16>
    %c2_43 = arith.constant 2 : index
    %c0_44 = arith.constant 0 : index
    %c0_45 = arith.constant 0 : index
    %50 = vector.load %arg4[%c2_43, %c0_44, %c0_45] : memref<3x8x128xf32, #tpu.memory_space<vmem>>, vector<1x8x128xf32>
    %51 = vector.shape_cast %50 : vector<1x8x128xf32> to vector<8x128xf32>
    %52 = arith.mulf %1, %51 : vector<8x128xf32>
    %53 = arith.truncf %52 : vector<8x128xf32> to vector<8x128xbf16>
    %c2_46 = arith.constant 2 : index
    %c0_47 = arith.constant 0 : index
    %c0_48 = arith.constant 0 : index
    %54 = vector.load %arg5[%c2_46, %c0_47, %c0_48] : memref<3x128x128xbf16, #tpu.memory_space<vmem>>, vector<1x128x128xbf16>
    %55 = vector.shape_cast %54 : vector<1x128x128xbf16> to vector<128x128xbf16>
    %cst_49 = arith.constant dense<0.000000e+00> : vector<8x128xf32>
    %56 = tpu.matmul %49, %55, %cst_49 {dimension_numbers = #tpu.dot_dimension_numbers<[1], [0], [0], [1], [0, 0, 1, 1], [], []>} : vector<8x128xbf16>, vector<128x128xbf16>, vector<8x128xf32> -> vector<8x128xf32>
    %c2_50 = arith.constant 2 : index
    %c0_51 = arith.constant 0 : index
    %c0_52 = arith.constant 0 : index
    %57 = vector.load %arg7[%c2_50, %c0_51, %c0_52] : memref<3x1x128xf32, #tpu.memory_space<vmem>>, vector<1x1x128xf32>
    %58 = vector.shape_cast %57 : vector<1x1x128xf32> to vector<1x128xf32>
    %59 = vector.broadcast %58 : vector<1x128xf32> to vector<8x128xf32>
    %60 = arith.addf %56, %59 : vector<8x128xf32>
    %c2_53 = arith.constant 2 : index
    %c0_54 = arith.constant 0 : index
    %c0_55 = arith.constant 0 : index
    %61 = vector.load %arg6[%c2_53, %c0_54, %c0_55] : memref<3x128x128xbf16, #tpu.memory_space<vmem>>, vector<1x128x128xbf16>
    %62 = vector.shape_cast %61 : vector<1x128x128xbf16> to vector<128x128xbf16>
    %cst_56 = arith.constant dense<0.000000e+00> : vector<8x128xf32>
    %63 = tpu.matmul %53, %62, %cst_56 {dimension_numbers = #tpu.dot_dimension_numbers<[1], [0], [0], [1], [0, 0, 1, 1], [], []>} : vector<8x128xbf16>, vector<128x128xbf16>, vector<8x128xf32> -> vector<8x128xf32>
    %c2_57 = arith.constant 2 : index
    %c0_58 = arith.constant 0 : index
    %c0_59 = arith.constant 0 : index
    %64 = vector.load %arg8[%c2_57, %c0_58, %c0_59] : memref<3x1x128xf32, #tpu.memory_space<vmem>>, vector<1x1x128xf32>
    %65 = vector.shape_cast %64 : vector<1x1x128xf32> to vector<1x128xf32>
    %66 = vector.broadcast %65 : vector<1x128xf32> to vector<8x128xf32>
    %67 = arith.addf %63, %66 : vector<8x128xf32>
    %68 = arith.addf %16, %23 : vector<8x128xf32>
    %69 = arith.negf %68 : vector<8x128xf32>
    %70 = math.exp %69 : vector<8x128xf32>
    %cst_60 = arith.constant 1.000000e+00 : f32
    %71 = vector.broadcast %cst_60 : f32 to vector<8x128xf32>
    %72 = arith.addf %71, %70 : vector<8x128xf32>
    %73 = arith.divf %71, %72 : vector<8x128xf32>
    %74 = arith.addf %38, %45 : vector<8x128xf32>
    %75 = arith.negf %74 : vector<8x128xf32>
    %76 = math.exp %75 : vector<8x128xf32>
    %cst_61 = arith.constant 1.000000e+00 : f32
    %77 = vector.broadcast %cst_61 : f32 to vector<8x128xf32>
    %78 = arith.addf %77, %76 : vector<8x128xf32>
    %79 = arith.divf %77, %78 : vector<8x128xf32>
    %80 = arith.mulf %73, %67 : vector<8x128xf32>
    %81 = arith.addf %60, %80 : vector<8x128xf32>
    %82 = math.tanh %81 : vector<8x128xf32>
    %83 = arith.subf %1, %82 : vector<8x128xf32>
    %84 = arith.mulf %79, %83 : vector<8x128xf32>
    %85 = arith.addf %82, %84 : vector<8x128xf32>
    %c0_62 = arith.constant 0 : index
    %c0_63 = arith.constant 0 : index
    %86 = vector.load %arg9[%c0_62, %c0_63] : memref<8x128xf32, #tpu.memory_space<vmem>>, vector<8x128xf32>
    tpu.vector_store %arg9[%c0_62, %c0_63], %85 {strides = array<i32>} : memref<8x128xf32, #tpu.memory_space<vmem>>, vector<8x128xf32>,
    return
  }
  func.func @transform_0(%arg0: i32) -> (i32, i32) {
    %c0_i32 = arith.constant 0 : i32
    %c0_i32_0 = arith.constant 0 : i32
    return %arg0, %c0_i32 : i32, i32
  }
  func.func @transform_1(%arg0: i32) -> (i32, i32) {
    %c0_i32 = arith.constant 0 : i32
    %c0_i32_0 = arith.constant 0 : i32
    return %arg0, %c0_i32 : i32, i32
  }
  func.func @transform_2(%arg0: i32) -> (i32, i32, i32) {
    %c0_i32 = arith.constant 0 : i32
    %c0_i32_0 = arith.constant 0 : i32
    %c0_i32_1 = arith.constant 0 : i32
    return %c0_i32, %arg0, %c0_i32_0 : i32, i32, i32
  }
  func.func @transform_3(%arg0: i32) -> (i32, i32, i32) {
    %c0_i32 = arith.constant 0 : i32
    %c0_i32_0 = arith.constant 0 : i32
    %c0_i32_1 = arith.constant 0 : i32
    return %c0_i32, %arg0, %c0_i32_0 : i32, i32, i32
  }
  func.func @transform_4(%arg0: i32) -> (i32, i32, i32) {
    %c0_i32 = arith.constant 0 : i32
    %c0_i32_0 = arith.constant 0 : i32
    %c0_i32_1 = arith.constant 0 : i32
    %c0_i32_2 = arith.constant 0 : i32
    return %c0_i32, %c0_i32_0, %c0_i32_1 : i32, i32, i32
  }
  func.func @transform_5(%arg0: i32) -> (i32, i32, i32) {
    %c0_i32 = arith.constant 0 : i32
    %c0_i32_0 = arith.constant 0 : i32
    %c0_i32_1 = arith.constant 0 : i32
    %c0_i32_2 = arith.constant 0 : i32
    return %c0_i32, %c0_i32_0, %c0_i32_1 : i32, i32, i32
  }
  func.func @transform_6(%arg0: i32) -> (i32, i32, i32) {
    %c0_i32 = arith.constant 0 : i32
    %c0_i32_0 = arith.constant 0 : i32
    %c0_i32_1 = arith.constant 0 : i32
    %c0_i32_2 = arith.constant 0 : i32
    return %c0_i32, %c0_i32_0, %c0_i32_1 : i32, i32, i32
  }
  func.func @transform_7(%arg0: i32) -> (i32, i32, i32) {
    %c0_i32 = arith.constant 0 : i32
    %c0_i32_0 = arith.constant 0 : i32
    %c0_i32_1 = arith.constant 0 : i32
    %c0_i32_2 = arith.constant 0 : i32
    return %c0_i32, %c0_i32_0, %c0_i32_1 : i32, i32, i32
  }
  func.func @transform_8(%arg0: i32) -> (i32, i32) {
    %c0_i32 = arith.constant 0 : i32
    %c0_i32_0 = arith.constant 0 : i32
    return %arg0, %c0_i32 : i32, i32
  }
}

</mosaic_0001>

<bundles_post_ra>
// kernel: tpu_custom_call.1
= control target key start
LH: loop header
LB: loop body
LE: loop exit
PB: predicated region body
PF: predicated region fallthrough
CT: control target
= control target key end

     0   :  { %s2715_s0 = inlined_call_operand.hbm [shape: f32[16,128], index: 0, kind: input, shape index: {}]   ;;  %s2716_s1 = inlined_call_operand.hbm [shape: f32[16,128], index: 1, kind: input, shape index: {}]   ;;  %s2717_s2 = inlined_call_operand.hbm [shape: f32[3,16,128], index: 2, kind: input, shape index: {}]   ;;  %s2718_s3 = inlined_call_operand.hbm [shape: f32[3,16,128], index: 3, kind: input, shape index: {}]   ;;  %s2719_s4 = inlined_call_operand.hbm [shape: bf16[3,128,128], index: 4, kind: input, shape index: {}]   ;;  %s2720_s5 = inlined_call_operand.hbm [shape: bf16[3,128,128], index: 5, kind: input, shape index: {}]   ;;  %s2721_s6 = inlined_call_operand.hbm [shape: f32[3,1,128], index: 6, kind: input, shape index: {}]   ;;  %s2722_s7 = inlined_call_operand.hbm [shape: f32[3,1,128], index: 7, kind: input, shape index: {}]   ;;  %s2723_s8 = inlined_call_operand.hbm [shape: f32[16,128], index: 8, kind: output, shape index: {}]  }
   0x1   :  { %2752 = sst [smem:[#allocation34_spill]] %s2716_s1 }
   0x2   :  { %2753 = sst [smem:[#allocation35_spill]] %s2719_s4 }
   0x3   :  { %2754 = sst [smem:[#allocation36_spill]] %s2720_s5 }
   0x4   :  { %2755 = sst [smem:[#allocation37_spill]] %s2723_s8 }
   0x5   :  { %13 = vsyncpa [#allocation3], 0 }
   0x6   :  { %15 = vsyncpa [#allocation3 + $0x1], 0 }
   0x7   :  { %16 = vsyncpa [#allocation6], 0 }
   0x8   :  { %18 = vsyncpa [#allocation6 + $0x1], 0 }
   0x9   :  { %19 = vsyncpa [#allocation9], 0 }
   0xa   :  { %21 = vsyncpa [#allocation9 + $0x1], 0 }
   0xb   :  { %22 = vsyncpa [#allocation12], 0 }
   0xc   :  { %23 = vsyncpa [#allocation15], 0 }
   0xd   :  { %24 = vsyncpa [#allocation4], 0 }
   0xe   :  { %26 = vsyncpa [#allocation4 + $0x1], 0  ;;  %s2225_s27 = smov 0   ;;  %s2227_s28 = smov 0  }
   0xf   :  { %s2229_s29 = smov 0   ;;  %s2231_s30 = smov 0  }
  0x10 LB: > { %2756 = sst [smem:[#allocation24_spill]] %s2148_s27  ;;  %s2246_s9 = sadd.s32 4294967295, %s2160_s30   ;;  %s2160_s30 = sphi %s2231_s30, %s2806_s30   ;;  %s2156_s29 = sphi %s2229_s29, %s2809_s29   ;;  %s2152_s28 = sphi %s2227_s28, %s2808_s28   ;;  %s2148_s27 = sphi %s2225_s27, %s2807_s27  }
  0x11   : > { %2757 = sst [smem:[#allocation25_spill]] %s2152_s28  ;;  %s1399_s10 = sadd.s32 4294967294, %s2160_s30  }
  0x12   : > { %2758 = sst [smem:[#allocation26_spill]] %s2156_s29  ;;  %p52_p0 = scmp.ne.s32.totalorder %s2152_s28, %s2148_s27 }
  0x13   : > { %2759 = sst [smem:[#allocation27_spill]] %s2246_s9  ;;  %p2724_p1 = scmp.eq.s32.totalorder %s2246_s9, 0 }
  0x14   : > { %p244_p3 = scmp.eq.s32.totalorder %s1399_s10, 1  ;;  %p1400_p5 = scmp.ge.s32.totalorder %s2160_s30, 1 }
  0x15   : > { %p2255_p4 = por %p2724_p1, %p52_p0  ;;  %p251_p7 = scmp.lt.s32.totalorder %s2160_s30, 3 }
  0x16   : > { %p2260_p6 = por %p244_p3, %p52_p0  ;;  %s2162_s14 = smov [#allocation10]  }
  0x17   : > { %s2760_s11 = scalar_select %p2255_p4, 1, 0 }
  0x18   : > { %s2762_s12 = scalar_select %p2260_p6, 1, 0 }
  0x19   : > { %2761 = sst [smem:[#allocation28_spill]] %s2760_s11  ;;  %p2265_p8 = pnand %p1400_p5, %p251_p7 }
  0x1a   : > { %2763 = sst [smem:[#allocation29_spill]] %s2762_s12  ;;  %s263_s15 = sshll.u32 %s2162_s14, 4  ;;  %s2269_s15 = int_to_ptr.vmem [resolvable:$true] %s263_s15 }
  0x1b   : > { %s2764_s13 = scalar_select %p2265_p8, 1, 0 }
  0x1c   : > { %p1699_p9 = pneg %p2265_p8  ;;  %s2163_s17 = smov [#allocation11]  }
  0x1d   : > { %2765 = sst [smem:[#allocation30_spill]] %s2764_s13  ;;  %s276_s18 = sshll.u32 %s2163_s17, 4  ;;  %s2280_s18 = int_to_ptr.vmem [resolvable:$true] %s276_s18 }
  0x1e   : > { %p2276_p11 = pnand %p1699_p9, %p2724_p1  ;;  %s2767_s4 = sld [smem:[#allocation35_spill]] }
  0x20   : > { %s2766_s16 = scalar_select %p2276_p11, 1, 0 }
  0x21   : > { %p2290_p13 = pneg %p2276_p11 }
  0x23   : > { %s2768_s24 = scalar_select %p2290_p13, 1, 0 }
  0x24   : > { %s1842_s21 = scalar_lea.hbm %s2767_s4, 3072 }
  0x25   : > { %p1843_p12 = scmp.ne.s32.totalorder %s2767_s4, %s1842_s21  ;;  %p1849_p5 = scmp.lt.u32.totalorder %s1842_s21, %s2767_s4 }
  0x27   : > { %p1845_p0 = pnand %p2290_p13, %p1843_p12 }
  0x29   : > { %p1846_p3 = pneg %p1845_p0 }
  0x2b   : > { %p1851_p7 = pnand %p1849_p5, %p1846_p3 }
  0x2d   : > { %1854 = shalt.err (!%p1851_p7)
}
  0x2e   : > { %s1855_s10 = scalar_lea.vmem %s2269_s15, 3072  ;;  %p1863_p2 = scmp.lt.s32.totalorder %s2269_s15, %s2269_s15 }
  0x2f   : > { %p1856_p9 = scmp.ne.s32.totalorder %s2269_s15, %s1855_s10  ;;  %p1864_p6 = scmp.lt.s32.totalorder %s1855_s10, %s1855_s10 }
  0x31   : > { %p1858_p10 = pnand %p1856_p9, %p2290_p13  ;;  %p1865_p12 = por %p1864_p6, %p1863_p2 }
  0x33   : > { %p1859_p1 = pneg %p1858_p10 }
  0x35   : > { %p1866_p0 = pnand %p1865_p12, %p1859_p1 }
  0x37   : > { %1869 = shalt.err (!%p1866_p0)
}
  0x38   : > { %s2164_s14 = smov 64   ;;  %s2165_s17 = smov 4  }
  0x39   : > { %1702 = dma.hbm_to_vmem [thread:$0]  (!%p2276_p11), %s2767_s4, 3072, %s2269_s15, [#allocation9], %s2164_s14, %s2164_s14, %s2165_s17  }
  0x3a   : > { %s2769_s5 = sld [smem:[#allocation36_spill]] }
  0x40   : > { %s1870_s23 = scalar_lea.hbm %s2769_s5, 3072 }
  0x41   : > { %p1871_p2 = scmp.ne.s32.totalorder %s2769_s5, %s1870_s23  ;;  %p1877_p10 = scmp.lt.u32.totalorder %s1870_s23, %s2769_s5 }
  0x43   : > { %p1873_p1 = pnand %p1871_p2, %p2290_p13 }
  0x45   : > { %p1874_p6 = pneg %p1873_p1 }
  0x47   : > { %p1879_p3 = pnand %p1877_p10, %p1874_p6 }
  0x49   : > { %1882 = shalt.err (!%p1879_p3)
}
  0x4a   : > { %s1883_s15 = scalar_lea.vmem %s2280_s18, 3072  ;;  %p1891_p12 = scmp.lt.s32.totalorder %s2280_s18, %s2280_s18 }
  0x4b   : > { %p1884_p5 = scmp.ne.s32.totalorder %s2280_s18, %s1883_s15  ;;  %p1892_p0 = scmp.lt.s32.totalorder %s1883_s15, %s1883_s15 }
  0x4d   : > { %p1886_p7 = pnand %p1884_p5, %p2290_p13  ;;  %p1893_p2 = por %p1892_p0, %p1891_p12 }
  0x4f   : > { %p1887_p9 = pneg %p1886_p7 }
  0x51   : > { %p1894_p1 = pnand %p1893_p2, %p1887_p9 }
  0x53   : > { %1897 = shalt.err (!%p1894_p1)
}
  0x54   : > { %1705 = dma.hbm_to_vmem [thread:$0]  (!%p2276_p11), %s2769_s5, 3072, %s2280_s18, [#allocation12], %s2164_s14, %s2164_s14, %s2165_s17  }
  0x55   : > { %s2335_s20 = sadd.s32 1, %s2160_s30   ;;  %s39_s21 = sadd.s32 1, %s2156_s29 }
  0x56   : > { %2770 = sst [smem:[#allocation31_spill]] %s2335_s20  ;;  %s36_s22 = ssub.s32 %s2160_s30, %s2335_s20 }
  0x57   : > { %p46_p6 = scmp.ne.s32.totalorder %s2156_s29, %s2152_s28  ;;  %p37_p10 = scmp.eq.s32.totalorder %s36_s22, 0 }
  0x58   : > { %p47_p3 = scmp.eq.s32.totalorder %s2160_s30, 0  ;;  %p2771_p5 = scmp.eq.s32.totalorder %s2246_s9, 1 }
  0x59   : > { %p1733_p9 = scmp.lt.s32.totalorder %s2160_s30, 2  ;;  %s2354_s26 = sand.u32 1, %s2156_s29  }
  0x5a   : > { %p2345_p7 = por %p2771_p5, %p46_p6  ;;  %p48_p12 = por %p47_p3, %p46_p6 }
  0x5b   : > { %s2351_s25 = scalar_select %p37_p10, %s2156_s29, %s39_s21  }
  0x5c   : > { %s2772_s23 = scalar_select %p2345_p7, 1, 0 }
  0x5d   : > { %2774 = sst [smem:[#allocation33_spill]] %s2351_s25  ;;  %s2729_s18 = sshll.u32 %s2354_s26, 3 }
  0x5e   : > { %2773 = sst [smem:[#allocation32_spill]] %s2772_s23  ;;  %s2358_s14 = sshll.u32 %s2160_s30, 7 }
  0x5f   : > { %p2360_p0 = pnand %p1733_p9, %p48_p12  ;;  %s2732_s10 = sand.u32 1, %s2160_s30  }
  0x60   : > { %s2776_s1 = sld [smem:[#allocation34_spill]]  ;;  %s338_s21 = scalar_lea.vmem [#allocation5], %s2729_s18 }
  0x61   : > { %s2775_s17 = scalar_select %p2360_p0, 1, 0 }
  0x62   : > { %s345_s22 = sshll.u32 %s338_s21, 4  ;;  %s2380_s29 = scalar_lea.hbm %s2717_s2, %s2358_s14  ;;  %s2374_s22 = int_to_ptr.vmem [resolvable:$true] %s345_s22 }
  0x63   : > { %s2384_s20 = scalar_lea.sflag [#allocation6], %s2732_s10  ;;  %p2390_p1 = pneg %p2360_p0 }
  0x65   : > { %s2777_s12 = scalar_select %p2390_p1, 1, 0 }
  0x66   : > { %s2369_s19 = scalar_lea.hbm %s2776_s1, %s2358_s14  ;;  %s1903_s5 = scalar_lea.hbm %s2776_s1, 256 }
  0x67   : > { %s1898_s15 = scalar_lea.hbm %s2369_s19, 128  ;;  %p1904_p3 = scmp.lt.u32.totalorder %s2369_s19, %s2776_s1 }
  0x68   : > { %p1899_p2 = scmp.ne.s32.totalorder %s2369_s19, %s1898_s15  ;;  %p1905_p5 = scmp.lt.u32.totalorder %s1903_s5, %s1898_s15 }
  0x69   : > { %p1907_p12 = scmp.lt.u32.totalorder %s1898_s15, %s2369_s19 }
  0x6a   : > { %p1901_p6 = pnand %p2390_p1, %p1899_p2  ;;  %p1906_p9 = por %p1905_p5, %p1904_p3 }
  0x6c   : > { %p1902_p10 = pneg %p1901_p6  ;;  %p1908_p7 = por %p1907_p12, %p1906_p9 }
  0x6e   : > { %p1909_p4 = pnand %p1908_p7, %p1902_p10 }
  0x70   : > { %1912 = shalt.err (!%p1909_p4)
}
  0x71   : > { %s1913_s10 = scalar_lea.vmem %s2374_s22, 128  ;;  %s2166_s18 = smov [#allocation5]  }
  0x72   : > { %p1914_p2 = scmp.ne.s32.totalorder %s2374_s22, %s1913_s10  ;;  %s1918_s21 = sshll.u32 %s2166_s18, 4  ;;  %s1919_s21 = int_to_ptr.vmem [resolvable:$false] %s1918_s21 }
  0x73   : > { %s1920_s4 = scalar_lea.vmem %s1919_s21, 256  ;;  %p1921_p11 = scmp.lt.s32.totalorder %s2374_s22, %s1919_s21 }
  0x74   : > { %p1916_p6 = pnand %p1914_p2, %p2390_p1  ;;  %p1922_p13 = scmp.lt.s32.totalorder %s1920_s4, %s1913_s10 }
  0x76   : > { %p1917_p8 = pneg %p1916_p6  ;;  %p1923_p3 = por %p1922_p13, %p1921_p11 }
  0x78   : > { %p1924_p5 = pnand %p1923_p3, %p1917_p8 }
  0x7a   : > { %1927 = shalt.err (!%p1924_p5)
}
  0x7b   : > { %1718 = dma.hbm_to_vmem [thread:$0]  (!%p2360_p0), %s2369_s19, 128, %s2374_s22, %s2384_s20  }
  0x7c   : > { %s2778_s15 = smul.u32 24, %s2354_s26  ;;  %s2422_s21 = scalar_lea.hbm %s2718_s3, %s2358_s14 }
  0x7d   : > { %s2167_s8 = smov [#allocation13]   ;;  %s1928_s22 = scalar_lea.hbm %s2721_s6, 48 }
  0x7e   : > { %s356_s5 = scalar_lea.vmem [#allocation7], %s2778_s15  ;;  %s2779_s4 = smov %s2778_s15 }
  0x7f   : > { %s362_s25 = sshll.u32 %s356_s5, 4  ;;  %s376_s1 = scalar_lea.vmem [#allocation8], %s2779_s4  ;;  %s2416_s25 = int_to_ptr.vmem [resolvable:$true] %s362_s25 }
  0x80   : > { %s382_s27 = sshll.u32 %s376_s1, 4  ;;  %s289_s23 = sshll.u32 %s2167_s8, 4  ;;  %s2426_s27 = int_to_ptr.vmem [resolvable:$true] %s382_s27  ;;  %s290_s23 = int_to_ptr.vmem [resolvable:$true] %s289_s23 }
  0x81   : > { %p1929_p4 = scmp.ne.s32.totalorder %s2721_s6, %s1928_s22  ;;  %p2780_p8 = scmp.ne.s32.totalorder %s2768_s24, 0 }
  0x82   : > { %p1935_p7 = scmp.lt.u32.totalorder %s1928_s22, %s2721_s6 }
  0x83   : > { %p1931_p11 = pnand %p1929_p4, %p2780_p8 }
  0x85   : > { %p1932_p13 = pneg %p1931_p11 }
  0x87   : > { %p1937_p10 = pnand %p1935_p7, %p1932_p13 }
  0x89   : > { %1940 = shalt.err (!%p1937_p10)
}
  0x8a   : > { %s1941_s1 = scalar_lea.vmem %s290_s23, 48  ;;  %s1948_s8 = scalar_lea.vmem %s290_s23, 64 }
  0x8b   : > { %p1942_p9 = scmp.ne.s32.totalorder %s290_s23, %s1941_s1  ;;  %p1949_p6 = scmp.lt.s32.totalorder %s290_s23, %s290_s23 }
  0x8c   : > { %p1950_p3 = scmp.lt.s32.totalorder %s1948_s8, %s1941_s1 }
  0x8d   : > { %p1944_p12 = pnand %p1942_p9, %p2780_p8 }
  0x8e   : > { %p1951_p5 = por %p1950_p3, %p1949_p6 }
  0x8f   : > { %p1945_p2 = pneg %p1944_p12 }
  0x91   : > { %p1952_p0 = pnand %p1951_p5, %p1945_p2 }
  0x93   : > { %1955 = shalt.err (!%p1952_p0)
}
  0x94   : > { %s2168_s9 = smov 16   ;;  %s2169_s4 = smov 1  }
  0x95   : > { %p2781_p4 = scmp.ne.s32.totalorder %s2766_s16, 0  ;;  %s2170_s15 = smov [#allocation14]  }
  0x96   : > { %s302_s5 = sshll.u32 %s2170_s15, 4  ;;  %s1956_s11 = scalar_lea.hbm %s2722_s7, 48  ;;  %s303_s5 = int_to_ptr.vmem [resolvable:$true] %s302_s5 }
  0x97   : > { %1708 = dma.hbm_to_vmem [thread:$0]  (!%p2781_p4), %s2721_s6, 48, %s290_s23, [#allocation12], %s2168_s9, %s2168_s9, %s2169_s4  }
  0x98   : > { %p1957_p0 = scmp.ne.s32.totalorder %s2722_s7, %s1956_s11  ;;  %p1963_p7 = scmp.lt.u32.totalorder %s1956_s11, %s2722_s7 }
  0x9a   : > { %p1959_p11 = pnand %p1957_p0, %p2780_p8 }
  0x9c   : > { %p1960_p13 = pneg %p1959_p11 }
  0x9e   : > { %p1965_p10 = pnand %p1963_p7, %p1960_p13 }
  0xa0   : > { %1968 = shalt.err (!%p1965_p10)
}
  0xa1   : > { %s1969_s23 = scalar_lea.vmem %s303_s5, 48  ;;  %s1976_s19 = scalar_lea.vmem %s303_s5, 64 }
  0xa2   : > { %p1970_p9 = scmp.ne.s32.totalorder %s303_s5, %s1969_s23  ;;  %p1977_p6 = scmp.lt.s32.totalorder %s303_s5, %s303_s5 }
  0xa3   : > { %p1978_p3 = scmp.lt.s32.totalorder %s1976_s19, %s1969_s23 }
  0xa4   : > { %p1972_p12 = pnand %p1970_p9, %p2780_p8 }
  0xa5   : > { %p1979_p5 = por %p1978_p3, %p1977_p6 }
  0xa6   : > { %p1973_p2 = pneg %p1972_p12 }
  0xa8   : > { %p1980_p1 = pnand %p1979_p5, %p1973_p2 }
  0xaa   : > { %1983 = shalt.err (!%p1980_p1)
}
  0xab   : > { %1711 = dma.hbm_to_vmem [thread:$0]  (!%p2781_p4), %s2722_s7, 48, %s303_s5, [#allocation15], %s2168_s9, %s2168_s9, %s2169_s4  }
  0xac   : > { %s2468_s13 = scalar_lea.hbm %s2715_s0, %s2358_s14  ;;  %s2782_s24 = sshll.u32 %s2354_s26, 3 }
  0xad   : > { %s320_s18 = scalar_lea.vmem [#allocation2], %s2782_s24  ;;  %s317_s10 = scalar_lea.sflag [#allocation3], %s2354_s26 }
  0xae   : > { %s327_s16 = sshll.u32 %s320_s18, 4  ;;  %s1984_s1 = scalar_lea.hbm %s2468_s13, 128  ;;  %s328_s16 = int_to_ptr.vmem [resolvable:$true] %s327_s16 }
  0xaf   : > { %p1985_p1 = scmp.ne.s32.totalorder %s2468_s13, %s1984_s1  ;;  %p2783_p8 = scmp.ne.s32.totalorder %s2777_s12, 0 }
  0xb0   : > { %s1989_s5 = scalar_lea.hbm %s2715_s0, 256  ;;  %p1990_p4 = scmp.lt.u32.totalorder %s2468_s13, %s2715_s0 }
  0xb1   : > { %p1987_p0 = pnand %p1985_p1, %p2783_p8  ;;  %p1991_p13 = scmp.lt.u32.totalorder %s1989_s5, %s1984_s1 }
  0xb2   : > { %p1993_p10 = scmp.lt.u32.totalorder %s1984_s1, %s2468_s13 }
  0xb3   : > { %p1988_p11 = pneg %p1987_p0  ;;  %p1992_p7 = por %p1991_p13, %p1990_p4 }
  0xb5   : > { %p1994_p9 = por %p1993_p10, %p1992_p7 }
  0xb7   : > { %p1995_p12 = pnand %p1994_p9, %p1988_p11 }
  0xb9   : > { %1998 = shalt.err (!%p1995_p12)
}
  0xba   : > { %s1999_s26 = scalar_lea.vmem %s328_s16, 128  ;;  %s2171_s23 = smov [#allocation2]  }
  0xbb   : > { %p2000_p2 = scmp.ne.s32.totalorder %s328_s16, %s1999_s26  ;;  %s2004_s19 = sshll.u32 %s2171_s23, 4  ;;  %s2005_s19 = int_to_ptr.vmem [resolvable:$false] %s2004_s19 }
  0xbc   : > { %s2006_s22 = scalar_lea.vmem %s2005_s19, 256  ;;  %p2007_p5 = scmp.lt.s32.totalorder %s328_s16, %s2005_s19 }
  0xbd   : > { %p2002_p6 = pnand %p2000_p2, %p2783_p8  ;;  %p2008_p1 = scmp.lt.s32.totalorder %s2006_s22, %s1999_s26 }
  0xbf   : > { %p2003_p3 = pneg %p2002_p6  ;;  %p2009_p0 = por %p2008_p1, %p2007_p5 }
  0xc1   : > { %p2010_p4 = pnand %p2009_p0, %p2003_p3 }
  0xc3   : > { %2013 = shalt.err (!%p2010_p4)
}
  0xc4   : > { %p2784_p13 = scmp.ne.s32.totalorder %s2775_s17, 0  ;;  %s2014_s15 = scalar_lea.hbm %s2380_s29, 384 }
  0xc5   : > { %p2015_p11 = scmp.ne.s32.totalorder %s2380_s29, %s2014_s15  ;;  %s2019_s24 = scalar_lea.hbm %s2717_s2, 768 }
  0xc6   : > { %1715 = dma.hbm_to_vmem [thread:$0]  (!%p2784_p13), %s2468_s13, 128, %s328_s16, %s317_s10  }
  0xc7   : > { %p2017_p7 = pnand %p2015_p11, %p2783_p8  ;;  %p2020_p9 = scmp.lt.u32.totalorder %s2380_s29, %s2717_s2 }
  0xc8   : > { %p2021_p12 = scmp.lt.u32.totalorder %s2019_s24, %s2014_s15  ;;  %p2023_p6 = scmp.lt.u32.totalorder %s2014_s15, %s2380_s29 }
  0xc9   : > { %p2018_p10 = pneg %p2017_p7 }
  0xca   : > { %p2022_p2 = por %p2021_p12, %p2020_p9 }
  0xcc   : > { %p2024_p3 = por %p2023_p6, %p2022_p2 }
  0xce   : > { %p2025_p5 = pnand %p2024_p3, %p2018_p10 }
  0xd0   : > { %2028 = shalt.err (!%p2025_p5)
}
  0xd1   : > { %s2029_s13 = scalar_lea.vmem %s2416_s25, 384  ;;  %s2172_s16 = smov [#allocation7]  }
  0xd2   : > { %p2030_p1 = scmp.ne.s32.totalorder %s2416_s25, %s2029_s13  ;;  %s2034_s10 = sshll.u32 %s2172_s16, 4  ;;  %s2035_s10 = int_to_ptr.vmem [resolvable:$false] %s2034_s10 }
  0xd3   : > { %s2036_s9 = scalar_lea.vmem %s2035_s10, 768  ;;  %p2037_p11 = scmp.lt.s32.totalorder %s2416_s25, %s2035_s10 }
  0xd4   : > { %p2032_p0 = pnand %p2030_p1, %p2783_p8  ;;  %p2038_p7 = scmp.lt.s32.totalorder %s2036_s9, %s2029_s13 }
  0xd6   : > { %p2033_p4 = pneg %p2032_p0  ;;  %p2039_p9 = por %p2038_p7, %p2037_p11 }
  0xd8   : > { %p2040_p12 = pnand %p2039_p9, %p2033_p4 }
  0xda   : > { %2043 = shalt.err (!%p2040_p12)
}
  0xdb   : > { %s2173_s4 = smov 256   ;;  %s2174_s5 = smov 128  }
  0xdc   : > { %s2175_s14 = smov 8   ;;  %s2785_s8 = sand.u32 1, %s2160_s30  }
  0xdd   : > { %1721 = dma.hbm_to_vmem [thread:$0]  (!%p2784_p13), %s2380_s29, 384, %s2416_s25, %s2384_s20, %s2173_s4, %s2174_s5, %s2175_s14  }
  0xde   : > { %s2517_s26 = scalar_lea.sflag [#allocation9], %s2785_s8  ;;  %s2044_s23 = scalar_lea.hbm %s2422_s21, 384 }
  0xdf   : > { %p2045_p10 = scmp.ne.s32.totalorder %s2422_s21, %s2044_s23  ;;  %s2049_s15 = scalar_lea.hbm %s2718_s3, 768 }
  0xe0   : > { %p2050_p3 = scmp.lt.u32.totalorder %s2422_s21, %s2718_s3  ;;  %p2051_p5 = scmp.lt.u32.totalorder %s2049_s15, %s2044_s23 }
  0xe1   : > { %p2047_p2 = pnand %p2045_p10, %p2783_p8  ;;  %p2053_p0 = scmp.lt.u32.totalorder %s2044_s23, %s2422_s21 }
  0xe2   : > { %p2052_p1 = por %p2051_p5, %p2050_p3 }
  0xe3   : > { %p2048_p6 = pneg %p2047_p2 }
  0xe4   : > { %p2054_p4 = por %p2053_p0, %p2052_p1 }
  0xe6   : > { %p2055_p11 = pnand %p2054_p4, %p2048_p6 }
  0xe8   : > { %2058 = shalt.err (!%p2055_p11)
}
  0xe9   : > { %s2059_s29 = scalar_lea.vmem %s2426_s27, 384  ;;  %s2176_s20 = smov [#allocation8]  }
  0xea   : > { %p2060_p7 = scmp.ne.s32.totalorder %s2426_s27, %s2059_s29  ;;  %s2064_s25 = sshll.u32 %s2176_s20, 4  ;;  %s2065_s25 = int_to_ptr.vmem [resolvable:$false] %s2064_s25 }
  0xeb   : > { %s2066_s24 = scalar_lea.vmem %s2065_s25, 768  ;;  %p2067_p10 = scmp.lt.s32.totalorder %s2426_s27, %s2065_s25 }
  0xec   : > { %p2062_p9 = pnand %p2060_p7, %p2783_p8  ;;  %p2068_p2 = scmp.lt.s32.totalorder %s2066_s24, %s2059_s29 }
  0xee   : > { %p2063_p12 = pneg %p2062_p9  ;;  %p2069_p3 = por %p2068_p2, %p2067_p10 }
  0xf0   : > { %p2070_p5 = pnand %p2069_p3, %p2063_p12 }
  0xf2   : > { %2073 = shalt.err (!%p2070_p5)
}
  0xf3   : > { %1724 = dma.hbm_to_vmem [thread:$0]  (!%p2784_p13), %s2422_s21, 384, %s2426_s27, %s2517_s26, %s2173_s4, %s2174_s5, %s2175_s14  }
  0xf4   : > { %s2786_s12 = sld [smem:[#allocation30_spill]] }
  0xfa   : > { %p2787_p8 = scmp.ne.s32.totalorder %s2786_s12, 0 }
  0xfb   : > { %s2788_s18 = sld [smem:[#allocation25_spill]] (!%p2787_p8)  ;;  %s2789_s1 = sld [smem:[#allocation28_spill]] (!%p2787_p8) }
  0xfc   : > { %394 = sbr.rel (%p2787_p8) target bundleno = 631 (0x277), region = 52 }
 0x101   : > { %s2547_s13 = sand.u32 (!%p2787_p8), 1, %s2788_s18   ;;  %p2790_p6 = scmp.ne.s32.totalorder (!%p2787_p8), %s2789_s1, 0 }
 0x102   : > { %s2550_s16 = sshll.u32 (!%p2787_p8), %s2547_s13, 3  ;;  %s397_s17 = scalar_lea.sflag (!%p2787_p8), [#allocation3], %s2547_s13 }
 0x103   : > { %s400_s10 = scalar_lea.vmem [#allocation2], %s2550_s16 }
 0x104   : > { %2119 = dma.done.wait (%p2790_p6), %s397_s17, 128  }
 0x105   : > { %2121 = vsyncadd (%p2790_p6), %s397_s17, 4294967168  ;;  %s2791_s27 = sld [smem:[#allocation27_spill]]  ;;  %s409_s4 = scalar_lea.vmem [#allocation5], %s2550_s16 }
 0x10b   : > { %s405_s21 = sand.u32 1, %s2791_s27  }
 0x10c   : > { %s406_s9 = scalar_lea.sflag [#allocation6], %s405_s21 }
 0x10d   : > { %2123 = dma.done.wait (%p2790_p6), %s406_s9, 512  }
 0x10e   : > { %2125 = vsyncadd (%p2790_p6), %s406_s9, 4294966784  ;;  %s1672_s5 = smul.u32 24, %s2547_s13  ;;  %s424_s8 = scalar_lea.sflag [#allocation9], %s405_s21 }
 0x110   : > { %s2565_s14 = scalar_lea.vmem [#allocation7], %s1672_s5  ;;  %s2567_s26 = scalar_lea.vmem [#allocation8], %s1672_s5 }
 0x111   : > { %2127 = dma.done.wait (%p2790_p6), %s424_s8, 384  }
 0x112   : > { %2129 = vsyncadd (%p2790_p6), %s424_s8, 4294966912  ;;  %p2792_p13 = scmp.eq.s32.totalorder %s2791_s27, 0 }
 0x114   : > { %2131 = dma.done.wait (%p2792_p13), [#allocation9], 3072   ;;  %p2793_p1 = pmov %p2792_p13 }
 0x116   : > { %2133 = vsyncadd (%p2793_p1), [#allocation9], 4294964224  ;;  %p2794_p0 = pmov %p2793_p1 }
 0x118   : > { %2135 = dma.done.wait (%p2794_p0), [#allocation12], 3120   ;;  %p2795_p4 = pmov %p2794_p0 }
 0x119   : > { %p2796_p11 = pmov %p2794_p0 }
 0x11a   : > { %2137 = vsyncadd (%p2795_p4), [#allocation12], 4294964176 }
 0x11b   : > { %2139 = dma.done.wait (%p2796_p11), [#allocation15], 48   ;;  %p2797_p7 = pmov %p2794_p0 }
 0x11c   : > { %v2177_v0 = vmov 0.0   ;;  %vm2178_vm0 = vmmov 0   ;;  %v1784_v1 = vld [vmem:[#allocation10] sm:$0xff]   ;;  %v1786_v3 = vld [vmem:[#allocation10 + $0x8] sm:$0xff]   ;;  %v1788_v5 = vld [vmem:[#allocation10 + $0x10] sm:$0xff]   ;;  %s2798_s23 = sld [smem:[#allocation32_spill]] }
 0x11d   : > { %2141 = vsyncadd (%p2797_p7), [#allocation15], 4294967248  ;;  %1538 = vmatprep.subr.bf16.mxu0 %v2177_v0  ;;  %1578 = vmatprep.subr.bf16.mxu1 %v2177_v0  ;;  %v1785_v2 = vld [vmem:[#allocation10 + $0x40] sm:$0xff]   ;;  %v1787_v4 = vld [vmem:[#allocation10 + $0x48] sm:$0xff]   ;;  %s1481_s19 = sshll.u32 %s2791_s27, 7  ;;  %s490_s22 = scalar_lea.vmem [#allocation16], %s2550_s16 }
 0x11e   : > { %1554 = vmatprep.mubr.msk.bf16.mxu0 %vm2178_vm0, %v2177_v0  ;;  %1594 = vmatprep.mubr.msk.bf16.mxu1 %vm2178_vm0, %v2177_v0  ;;  %v1789_v6 = vld [vmem:[#allocation10 + $0x50] sm:$0xff]   ;;  %v1790_v7 = vld [vmem:[#allocation10 + $0x18] sm:$0xff]   ;;  %v1792_v9 = vld [vmem:[#allocation10 + $0x20] sm:$0xff]   ;;  %s1225_s15 = sshll.u32 %s490_s22, 4  ;;  %s2799_s29 = sld [smem:[#allocation37_spill]]  ;;  %s2673_s15 = int_to_ptr.vmem [resolvable:$true] %s1225_s15 }
 0x11f   : > { %1539 = vmatpush3.bf16.msra.mxu0 %v1784_v1  ;;  %1579 = vmatpush3.bf16.msra.mxu1 %v1785_v2  ;;  %v1791_v8 = vld [vmem:[#allocation10 + $0x58] sm:$0xff]   ;;  %v1793_v10 = vld [vmem:[#allocation10 + $0x60] sm:$0xff]   ;;  %v1794_v11 = vld [vmem:[#allocation10 + $0x28] sm:$0xff]   ;;  %s1212_s24 = scalar_lea.sflag [#allocation4], %s2547_s13  ;;  %s2074_s12 = scalar_lea.vmem %s2673_s15, 128 }
 0x120   : > { %1540 = vmatprep.subr.bf16.mxu0 %v2177_v0  ;;  %1580 = vmatprep.subr.bf16.mxu1 %v2177_v0  ;;  %v1795_v12 = vld [vmem:[#allocation10 + $0x68] sm:$0xff]   ;;  %v1796_v13 = vld [vmem:[#allocation10 + $0x30] sm:$0xff]   ;;  %v494_v16 = vld [vmem:[%s2565_s14] sm:$0xff]  ;;  %p2075_p9 = scmp.ne.s32.totalorder %s2673_s15, %s2074_s12  ;;  %s2179_s18 = smov [#allocation16]  }
 0x121   : > { %v1797_v14 = vld [vmem:[#allocation10 + $0x70] sm:$0xff]   ;;  %v2603_v15 = vld [vmem:[%s400_s10] sm:$0xff]  ;;  %v1438_v17 = vld [vmem:[%s2565_s14 + $0x8] sm:$0xff]  ;;  %s2078_s1 = sshll.u32 %s2179_s18, 4  ;;  %s2079_s1 = int_to_ptr.vmem [resolvable:$false] %s2078_s1 }
 0x122   : > { %v495_v18 = vmul.f32 %v494_v16, %v2603_v15  ;;  %v1798_v19 = vld [vmem:[#allocation10 + $0x38] sm:$0xff]   ;;  %v724_v20 = vmul.f32 %v1438_v17, %v2603_v15  ;;  %v1800_v23 = vld [vmem:[#allocation11] sm:$0xff]   ;;  %v1802_v26 = vld [vmem:[#allocation11 + $0x8] sm:$0xff]   ;;  %p2801_p12 = scmp.ne.s32.totalorder %s2798_s23, 0  ;;  %s2080_s16 = scalar_lea.vmem %s2079_s1, 256 }
 0x123   : > { %1541 = vmatpush3.bf16.msra.mxu0 %v1786_v3  ;;  %1581 = vmatpush3.bf16.msra.mxu1 %v1787_v4  ;;  %v1799_v21 = vld [vmem:[#allocation10 + $0x78] sm:$0xff]   ;;  %v1801_v25 = vld [vmem:[#allocation11 + $0x40] sm:$0xff]   ;;  %v1803_v27 = vld [vmem:[#allocation11 + $0x48] sm:$0xff]   ;;  %p2081_p3 = scmp.lt.s32.totalorder %s2673_s15, %s2079_s1  ;;  %p2082_p5 = scmp.lt.s32.totalorder %s2080_s16, %s2074_s12 }
 0x124   : > { %1542 = vmatprep.subr.bf16.mxu0 %v2177_v0  ;;  %1582 = vmatprep.subr.bf16.mxu1 %v2177_v0  ;;  %v496_v22 = vpack.c.bf16 %v495_v18, %v495_v18  ;;  %v725_v24 = vpack.c.bf16 %v724_v20, %v724_v20  ;;  %v1804_v28 = vld [vmem:[#allocation11 + $0x10] sm:$0xff]   ;;  %v1806_v30 = vld [vmem:[#allocation11 + $0x18] sm:$0xff]   ;;  %v1808_v32 = vld [vmem:[#allocation11 + $0x20] sm:$0xff]   ;;  %s2800_s20 = smov %s2799_s29  ;;  %s2671_s25 = scalar_lea.hbm %s2799_s29, %s1481_s19 }
 0x125   : > { %v1805_v29 = vld [vmem:[#allocation11 + $0x50] sm:$0xff]   ;;  %v1807_v31 = vld [vmem:[#allocation11 + $0x58] sm:$0xff]   ;;  %v1809_v33 = vld [vmem:[#allocation11 + $0x60] sm:$0xff]   ;;  %p2076_p10 = pnand %p2075_p9, %p2801_p12  ;;  %p2083_p8 = por %p2082_p5, %p2081_p3 }
 0x126   : > { %v1810_v34 = vld [vmem:[#allocation11 + $0x28] sm:$0xff]   ;;  %v1812_v36 = vld [vmem:[#allocation11 + $0x30] sm:$0xff]   ;;  %v1814_v42 = vld [vmem:[#allocation11 + $0x38] sm:$0xff]  }
 0x127   : > { %1543 = vmatpush3.bf16.msra.mxu0 %v1788_v5  ;;  %1583 = vmatpush3.bf16.msra.mxu1 %v1789_v6  ;;  %v1811_v35 = vld [vmem:[#allocation11 + $0x68] sm:$0xff]   ;;  %v2631_v37 = vld [vmem:[%s409_s4] sm:$0xff]  ;;  %v1439_v40 = vld [vmem:[%s2567_s26 + $0x8] sm:$0xff]  ;;  %p2077_p2 = pneg %p2076_p10 }
 0x128   : > { %1544 = vmatprep.subr.bf16.mxu0 %v2177_v0  ;;  %1584 = vmatprep.subr.bf16.mxu1 %v2177_v0  ;;  %v497_v38 = vld [vmem:[%s2567_s26] sm:$0xff]  ;;  %v728_v43 = vmul.f32 %v1439_v40, %v2631_v37  ;;  %v1815_v44 = vld [vmem:[#allocation11 + $0x78] sm:$0xff]   ;;  %v1816_v47 = vld [vmem:[#allocation10 + $0x80] sm:$0xff]  }
 0x129   : > { %v1813_v39 = vld [vmem:[#allocation11 + $0x70] sm:$0xff]   ;;  %v498_v41 = vmul.f32 %v497_v38, %v2631_v37  ;;  %v1817_v48 = vld [vmem:[#allocation11 + $0x80] sm:$0xff]   ;;  %v1818_v49 = vld [vmem:[#allocation10 + $0x88] sm:$0xff]   ;;  %p2084_p6 = pnand %p2083_p8, %p2077_p2 }
 0x12a   : > { %v729_v46 = vpack.c.bf16 %v728_v43, %v728_v43  ;;  %v1819_v50 = vld [vmem:[#allocation11 + $0x88] sm:$0xff]   ;;  %v1820_v51 = vld [vmem:[#allocation10 + $0x90] sm:$0xff]   ;;  %v1822_v53 = vld [vmem:[#allocation10 + $0x98] sm:$0xff]  }
 0x12b   : > { %1545 = vmatpush3.bf16.msra.mxu0 %v1790_v7  ;;  %1585 = vmatpush3.bf16.msra.mxu1 %v1791_v8  ;;  %v499_v45 = vpack.c.bf16 %v498_v41, %v498_v41  ;;  %v1821_v52 = vld [vmem:[#allocation11 + $0x90] sm:$0xff]   ;;  %v1823_v54 = vld [vmem:[#allocation11 + $0x98] sm:$0xff]   ;;  %v1824_v55 = vld [vmem:[#allocation10 + $0xa0] sm:$0xff]  }
 0x12c   : > { %1546 = vmatprep.subr.bf16.mxu0 %v2177_v0  ;;  %1586 = vmatprep.subr.bf16.mxu1 %v2177_v0  ;;  %v1825_v56 = vld [vmem:[#allocation11 + $0xa0] sm:$0xff]   ;;  %v1826_v57 = vld [vmem:[#allocation10 + $0xa8] sm:$0xff]   ;;  %v1828_v59 = vld [vmem:[#allocation10 + $0xb0] sm:$0xff]  }
 0x12d   : > { %v1827_v58 = vld [vmem:[#allocation11 + $0xa8] sm:$0xff]   ;;  %v1829_v61 = vld [vmem:[#allocation11 + $0xb0] sm:$0xff]   ;;  %v1459_v62 = vld [vmem:[%s2567_s26 + $0x10] sm:$0xff] }
 0x12e   : > { %v1458_v60 = vld [vmem:[%s2565_s14 + $0x10] sm:$0xff]  ;;  %v1830_v1 = vld [vmem:[#allocation10 + $0xb8] sm:$0xff]   ;;  %v962_v2 = vmul.f32 %v1459_v62, %v2631_v37  ;;  %v1420_v6 = vld [vmem:[#allocation13] ss:$0 sm:$0xff] }
 0x12f   : > { %1547 = vmatpush3.bf16.msra.mxu0 %v1792_v9  ;;  %1587 = vmatpush3.bf16.msra.mxu1 %v1793_v10  ;;  %v958_v63 = vmul.f32 %v1458_v60, %v2603_v15  ;;  %v1831_v3 = vld [vmem:[#allocation11 + $0xb8] sm:$0xff]   ;;  %v1429_v7 = vld [vmem:[#allocation14] ss:$0 sm:$0xff] }
 0x130   : > { %1548 = vmatprep.subr.bf16.mxu0 %v2177_v0  ;;  %1588 = vmatprep.subr.bf16.mxu1 %v2177_v0  ;;  %v963_v5 = vpack.c.bf16 %v962_v2, %v962_v2  ;;  %v1658_v8 = vadd.f32 %v1429_v7, %v1420_v6 }
 0x131   : > { %v959_v4 = vpack.c.bf16 %v958_v63, %v958_v63 }
 0x133   : > { %1549 = vmatpush3.bf16.msra.mxu0 %v1794_v11  ;;  %1589 = vmatpush3.bf16.msra.mxu1 %v1795_v12 }
 0x134   : > { %1550 = vmatprep.subr.bf16.mxu0 %v2177_v0  ;;  %1590 = vmatprep.subr.bf16.mxu1 %v2177_v0 }
 0x137   : > { %1551 = vmatpush3.bf16.msra.mxu0 %v1796_v13  ;;  %1591 = vmatpush3.bf16.msra.mxu1 %v1797_v14 }
 0x138   : > { %1552 = vmatprep.subr.bf16.mxu0 %v2177_v0  ;;  %1592 = vmatprep.subr.bf16.mxu1 %v2177_v0 }
 0x13b   : > { %1553 = vmatpush3.bf16.msra.mxu0 %v1798_v19  ;;  %1593 = vmatpush3.bf16.msra.mxu1 %v1799_v21  ;;  %v1449_v19 = vld [vmem:[#allocation14 + $0x1] ss:$0 sm:$0xff] }
 0x13c   : > { %1558 = vmatprep.subr.bf16.mxu0 %v2177_v0  ;;  %1598 = vmatprep.subr.bf16.mxu1 %v2177_v0 }
 0x13e   : > { %1555 = vmatmul.mubr.bf16.vlgmr.msra.gmra.mrb[0].mxu0 %v496_v22  ;;  %1595 = vmatmul.mubr.bf16.vlgmr.msra.gmra.mrb[0].mxu1 %v725_v24 }
 0x13f   : > { %1559 = vmatpush3.bf16.msra.mxu0 %v1800_v23  ;;  %1599 = vmatpush3.bf16.msra.mxu1 %v1801_v25  ;;  %v1460_v25 = vld [vmem:[#allocation13 + $0x2] ss:$0 sm:$0xff] }
 0x140   : > { %1560 = vmatprep.subr.bf16.mxu0 %v2177_v0  ;;  %1600 = vmatprep.subr.bf16.mxu1 %v2177_v0 }
 0x141   : > { %1574 = vmatprep.mubr.msk.bf16.mxu0 %vm2178_vm0, %v2177_v0  ;;  %1614 = vmatprep.mubr.msk.bf16.mxu1 %vm2178_vm0, %v2177_v0 }
 0x143   : > { %1561 = vmatpush3.bf16.msra.mxu0 %v1802_v26  ;;  %1601 = vmatpush3.bf16.msra.mxu1 %v1803_v27  ;;  %v1469_v26 = vld [vmem:[#allocation14 + $0x2] ss:$0 sm:$0xff] }
 0x144   : > { %1562 = vmatprep.subr.bf16.mxu0 %v2177_v0  ;;  %1602 = vmatprep.subr.bf16.mxu1 %v2177_v0 }
 0x147   : > { %1563 = vmatpush3.bf16.msra.mxu0 %v1804_v28  ;;  %1603 = vmatpush3.bf16.msra.mxu1 %v1805_v29 }
 0x148   : > { %1564 = vmatprep.subr.bf16.mxu0 %v2177_v0  ;;  %1604 = vmatprep.subr.bf16.mxu1 %v2177_v0 }
 0x14b   : > { %1565 = vmatpush3.bf16.msra.mxu0 %v1806_v30  ;;  %1605 = vmatpush3.bf16.msra.mxu1 %v1807_v31 }
 0x14c   : > { %1566 = vmatprep.subr.bf16.mxu0 %v2177_v0  ;;  %1606 = vmatprep.subr.bf16.mxu1 %v2177_v0 }
 0x14f   : > { %1567 = vmatpush3.bf16.msra.mxu0 %v1808_v32  ;;  %1607 = vmatpush3.bf16.msra.mxu1 %v1809_v33 }
 0x150   : > { %1568 = vmatprep.subr.bf16.mxu0 %v2177_v0  ;;  %1608 = vmatprep.subr.bf16.mxu1 %v2177_v0 }
 0x153   : > { %1569 = vmatpush3.bf16.msra.mxu0 %v1810_v34  ;;  %1609 = vmatpush3.bf16.msra.mxu1 %v1811_v35 }
 0x154   : > { %1570 = vmatprep.subr.bf16.mxu0 %v2177_v0  ;;  %1610 = vmatprep.subr.bf16.mxu1 %v2177_v0 }
 0x157   : > { %1571 = vmatpush3.bf16.msra.mxu0 %v1812_v36  ;;  %1611 = vmatpush3.bf16.msra.mxu1 %v1813_v39 }
 0x158   : > { %1572 = vmatprep.subr.bf16.mxu0 %v2177_v0  ;;  %1612 = vmatprep.subr.bf16.mxu1 %v2177_v0 }
 0x15b   : > { %1573 = vmatpush3.bf16.msra.mxu0 %v1814_v42  ;;  %1613 = vmatpush3.bf16.msra.mxu1 %v1815_v44 }
 0x15c   : > { %1618 = vmatprep.subr.bf16.mxu0 %v2177_v0  ;;  %1638 = vmatprep.subr.bf16.mxu1 %v2177_v0 }
 0x15e   : > { %1575 = vmatmul.mubr.bf16.vlgmr.msra.gmra.mrb[0].mxu0 %v499_v45  ;;  %1615 = vmatmul.mubr.bf16.vlgmr.msra.gmra.mrb[0].mxu1 %v729_v46 }
 0x15f   : > { %1619 = vmatpush3.bf16.msra.mxu0 %v1816_v47  ;;  %1639 = vmatpush3.bf16.msra.mxu1 %v1817_v48 }
 0x160   : > { %1620 = vmatprep.subr.bf16.mxu0 %v2177_v0  ;;  %1640 = vmatprep.subr.bf16.mxu1 %v2177_v0 }
 0x161   : > { %1634 = vmatprep.mubr.msk.bf16.mxu0 %vm2178_vm0, %v2177_v0  ;;  %1654 = vmatprep.mubr.msk.bf16.mxu1 %vm2178_vm0, %v2177_v0 }
 0x163   : > { %1621 = vmatpush3.bf16.msra.mxu0 %v1818_v49  ;;  %1641 = vmatpush3.bf16.msra.mxu1 %v1819_v50 }
 0x164   : > { %1622 = vmatprep.subr.bf16.mxu0 %v2177_v0  ;;  %1642 = vmatprep.subr.bf16.mxu1 %v2177_v0 }
 0x167   : > { %1623 = vmatpush3.bf16.msra.mxu0 %v1820_v51  ;;  %1643 = vmatpush3.bf16.msra.mxu1 %v1821_v52 }
 0x168   : > { %1624 = vmatprep.subr.bf16.mxu0 %v2177_v0  ;;  %1644 = vmatprep.subr.bf16.mxu1 %v2177_v0 }
 0x16b   : > { %1625 = vmatpush3.bf16.msra.mxu0 %v1822_v53  ;;  %1645 = vmatpush3.bf16.msra.mxu1 %v1823_v54 }
 0x16c   : > { %1626 = vmatprep.subr.bf16.mxu0 %v2177_v0  ;;  %1646 = vmatprep.subr.bf16.mxu1 %v2177_v0 }
 0x16f   : > { %1627 = vmatpush3.bf16.msra.mxu0 %v1824_v55  ;;  %1647 = vmatpush3.bf16.msra.mxu1 %v1825_v56 }
 0x170   : > { %1628 = vmatprep.subr.bf16.mxu0 %v2177_v0  ;;  %1648 = vmatprep.subr.bf16.mxu1 %v2177_v0 }
 0x173   : > { %1629 = vmatpush3.bf16.msra.mxu0 %v1826_v57  ;;  %1649 = vmatpush3.bf16.msra.mxu1 %v1827_v58 }
 0x174   : > { %1630 = vmatprep.subr.bf16.mxu0 %v2177_v0  ;;  %1650 = vmatprep.subr.bf16.mxu1 %v2177_v0 }
 0x177   : > { %1631 = vmatpush3.bf16.msra.mxu0 %v1828_v59  ;;  %1651 = vmatpush3.bf16.msra.mxu1 %v1829_v61 }
 0x178   : > { %1632 = vmatprep.subr.bf16.mxu0 %v2177_v0  ;;  %1652 = vmatprep.subr.bf16.mxu1 %v2177_v0  ;;  %v1440_v0 = vld [vmem:[#allocation13 + $0x1] ss:$0 sm:$0xff] }
 0x179   : > { %v1660_v20 = vadd.f32 %v1449_v19, %v1440_v0 }
 0x17b   : > { %1633 = vmatpush3.bf16.msra.mxu0 %v1830_v1  ;;  %1653 = vmatpush3.bf16.msra.mxu1 %v1831_v3 }
 0x17e   : > { %1635 = vmatmul.mubr.bf16.vlgmr.msra.gmra.mrb[4].mxu0 %v959_v4  ;;  %1655 = vmatmul.mubr.bf16.vlgmr.msra.gmra.mrb[4].mxu1 %v963_v5 }
 0x231   : > { %v716_v9 = vpop.f32.mrb[0].mxu0  ;;  %v950_v11 = vpop.f32.mrb[0].mxu1 }
 0x232   : > { %v1659_v10 = vadd.f32 %v1658_v8, %v716_v9  ;;  %v1576_v12 = vpop.f32.mrb[1].mxu0  ;;  %v1616_v13 = vpop.f32.mrb[1].mxu1  ;;  %v1661_v21 = vadd.f32 %v1660_v20, %v950_v11 }
 0x233   : > { %v719_v14 = vpop.f32.mrb[2].mxu0  ;;  %v953_v15 = vpop.f32.mrb[2].mxu1 }
 0x234   : > { %v1577_v16 = vpop.f32.mrb[3].mxu0  ;;  %v1478_v17 = vmul.f32 -1.442695, %v1659_v10  ;;  %v1617_v18 = vpop.f32.mrb[3].mxu1  ;;  %v1479_v23 = vmul.f32 -1.442695, %v1661_v21 }
 0x236   : > { %1832 = vpow2.f32 %v1478_v17 }
 0x237   : > { %1834 = vpow2.f32 %v1479_v23 }
 0x240   : > { %v1833_v22 = vpop.eup %1832 }
 0x241   : > { %v1194_v24 = vadd.f32 1.0, %v1833_v22  ;;  %v1835_v30 = vpop.eup %1834 }
 0x242   : > { %v1201_v41 = vadd.f32 1.0, %v1835_v30 }
 0x243   : > { %1836 = vrcp.f32 %v1194_v24 }
 0x24d   : > { %v1837_v35 = vpop.eup %1836 }
 0x251   : > { %v1071_v27 = vpop.f32.mrb[4].mxu0  ;;  %v1184_v28 = vpop.f32.mrb[4].mxu1 }
 0x252   : > { %v1636_v29 = vpop.f32.mrb[5].mxu0  ;;  %v1072_v31 = vadd.f32 %v1460_v25, %v1071_v27  ;;  %v1185_v32 = vadd.f32 %v1469_v26, %v1184_v28  ;;  %v1656_v33 = vpop.f32.mrb[5].mxu1 }
 0x253   : > { %v1074_v34 = vpop.f32.mrb[6].mxu0  ;;  %v1187_v36 = vpop.f32.mrb[6].mxu1 }
 0x254   : > { %v1637_v38 = vpop.f32.mrb[7].mxu0  ;;  %v1204_v39 = vmul.f32 %v1837_v35, %v1185_v32  ;;  %v1657_v40 = vpop.f32.mrb[7].mxu1 }
 0x256   : > { %v1205_v42 = vadd.f32 %v1204_v39, %v1072_v31 }
 0x258   : > { %1838 = vtanh.f32 %v1205_v42 }
 0x259   : > { %1840 = vrcp.f32 %v1201_v41 }
 0x262   : > { %v1839_v43 = vpop.eup %1838 }
 0x263   : > { %v1207_v44 = vsub.f32 %v2631_v37, %v1839_v43  ;;  %v1841_v45 = vpop.eup %1840 }
 0x265   : > { %v1208_v46 = vmul.f32 %v1841_v45, %v1207_v44 }
 0x267   : > { %v1209_v47 = vadd.f32 %v1839_v43, %v1208_v46 }
 0x269   : > { %1210 = vst [vmem:[%s490_s22] sm:$0xff] %v1209_v47 }
 0x26a   : > { %2087 = shalt.err (!%p2084_p6)
}
 0x26b   : > { %s2088_s13 = scalar_lea.hbm %s2671_s25, 128  ;;  %s2092_s27 = scalar_lea.hbm %s2800_s20, 256 }
 0x26c   : > { %p2089_p13 = scmp.ne.s32.totalorder %s2671_s25, %s2088_s13  ;;  %p2093_p4 = scmp.lt.u32.totalorder %s2671_s25, %s2800_s20 }
 0x26d   : > { %p2094_p11 = scmp.lt.u32.totalorder %s2092_s27, %s2088_s13  ;;  %p2096_p9 = scmp.lt.u32.totalorder %s2088_s13, %s2671_s25 }
 0x26e   : > { %p2090_p1 = pnand %p2089_p13, %p2801_p12 }
 0x26f   : > { %p2095_p7 = por %p2094_p11, %p2093_p4 }
 0x270   : > { %p2091_p0 = pneg %p2090_p1 }
 0x271   : > { %p2097_p10 = por %p2096_p9, %p2095_p7 }
 0x273   : > { %p2098_p2 = pnand %p2097_p10, %p2091_p0 }
 0x275   : > { %2101 = shalt.err (!%p2098_p2)
}
 0x276   : > { %1697 = dma.vmem_to_hbm [thread:$0]  (%p2801_p12), %s2673_s15, 128, %s2671_s25, %s1212_s24  }
 0x277 PF: > { %s2802_s4 = sld [smem:[#allocation24_spill]]  ;;  %s2803_s5 = sld [smem:[#allocation29_spill]] }
 0x278   : > { %p2805_p5 = scmp.ge.s32.totalorder %s2160_s30, 2 }
 0x27d   : > { %s1237_s14 = sand.u32 1, %s2802_s4   ;;  %p2804_p3 = scmp.ne.s32.totalorder %s2803_s5, 0 }
 0x27e   : > { %s1238_s8 = scalar_lea.sflag [#allocation4], %s1237_s14 }
 0x27f   : > { %p1726_p8 = pnand %p2805_p5, %p2804_p3 }
 0x281   : > { %2143 = dma.done.wait (!%p1726_p8), %s1238_s8, 128  }
 0x282   : > { %2145 = vsyncadd (!%p1726_p8), %s1238_s8, 4294967168  ;;  %s2806_s30 = sld [smem:[#allocation31_spill]]  ;;  %s2807_s27 = sld [smem:[#allocation25_spill]] }
 0x283   : > { %s2808_s28 = sld [smem:[#allocation26_spill]]  ;;  %s2809_s29 = sld [smem:[#allocation33_spill]] }
 0x288   : > { %p29_p6 = scmp.ge.s32.totalorder %s2806_s30, 4  }
 0x28a   :  { %31 = sbr.rel (!%p29_p6) target bundleno = 16 (0x10), region = 162 }
 0x291   :  { %1243 = vsyncpa [#allocation3], 1 }
 0x292   :  { %1245 = vsyncpa [#allocation3 + $0x1], 1 }
 0x293   :  { %1246 = vsyncpa [#allocation6], 1 }
 0x294   :  { %1248 = vsyncpa [#allocation6 + $0x1], 1 }
 0x295   :  { %1249 = vsyncpa [#allocation9], 1 }
 0x296   :  { %1251 = vsyncpa [#allocation9 + $0x1], 1 }
 0x297   :  { %1252 = vsyncpa [#allocation12], 1 }
 0x298   :  { %1253 = vsyncpa [#allocation15], 1 }
 0x299   :  { %1254 = vsyncpa [#allocation4], 1 }
 0x29a   :  { %1256 = vsyncpa [#allocation4 + $0x1], 1 }

</bundles_post_ra>
